<compile_context>
chip_gen: v5e
topology: v5e:2x2
jax: 0.10.0
libtpu: 0.0.40
codegen_flags: <defaults>
</compile_context>

<pallas_src>
import functools

import jax
import jax.numpy as jnp
from jax.experimental import pallas as pl
from jax.experimental.pallas import tpu as pltpu


def _round_up(n, m):
    return ((n + m - 1) // m) * m


def _mlp_kernel(s_ref, a_ref, ns_ref,
                w1s_ref, w1a_ref, w1ns_ref, b1_ref,
                w2_ref, b2_ref,
                w3_ref, b3_ref,
                o_ref, *, mxu_dtype):
    """One batch tile of the 3-layer MLP.

    s:  [TB, sd]  a: [TB, ad]  ns: [TB, sd]
    w1*: [sd|ad|sd, H]  b1,b2,w3(row): [1, H]  w2: [H, H]  b3: SMEM (1,1)
    o:  [TB, 1]
    """
    f32 = jnp.float32

    # ---- layer 1: concat fused as three partial MXU dots, f32 accumulate.
    h = jnp.dot(s_ref[...].astype(mxu_dtype), w1s_ref[...],
                preferred_element_type=f32)
    h = h + jnp.dot(a_ref[...].astype(mxu_dtype), w1a_ref[...],
                    preferred_element_type=f32)
    h = h + jnp.dot(ns_ref[...].astype(mxu_dtype), w1ns_ref[...],
                    preferred_element_type=f32)
    h1 = jnp.tanh(h + b1_ref[...])          # bias / tanh in f32 (v5e-safe)

    # ---- layer 2: MXU dot, f32 accumulate, f32 tanh.
    h2 = jnp.tanh(
        jnp.dot(h1.astype(mxu_dtype), w2_ref[...], preferred_element_type=f32)
        + b2_ref[...]
    )

    # ---- layer 3 (N=1): VPU multiply + XLU lane reduction instead of an MXU
    # pass that would use 1 of 128/256 output columns.
    out = jnp.sum(h2 * w3_ref[...], axis=-1, keepdims=True) + b3_ref[0, 0]
    o_ref[...] = out.astype(o_ref.dtype)


def reward_predictor_forward(state, action, next_state, params, *,
                             block_b=1024, use_bf16_mxu=True):
    """Pallas forward pass of RewardPredictor.

    state, next_state: [B, state_dim]; action: [B, action_dim]; float32.
    Returns [B, 1] float32.
    """
    w1, b1, w2, b2, w3, b3 = params
    B, sd = state.shape
    ad = action.shape[1]
    H = w1.shape[1]

    mxu_dtype = jnp.bfloat16 if use_bf16_mxu else jnp.float32

    # Split W1 along its input dim so the concat happens inside the kernel.
    w1s = w1[:sd].astype(mxu_dtype)
    w1a = w1[sd:sd + ad].astype(mxu_dtype)
    w1ns = w1[sd + ad:].astype(mxu_dtype)
    w2c = w2.astype(mxu_dtype)
    w3_row = w3.reshape(1, H).astype(jnp.float32)      # consumed on the VPU
    b1_2d = b1.reshape(1, H).astype(jnp.float32)
    b2_2d = b2.reshape(1, H).astype(jnp.float32)
    b3_2d = b3.reshape(1, 1).astype(jnp.float32)       # SMEM scalar

    # Batch tile: multiple of 8 sublanes, big enough to fill the MXU M dim and
    # amortize the ~0.35us per-grid-step overhead, capped so double-buffered
    # activation tiles + resident weights stay well inside scoped VMEM on
    # every generation (v5e/v6e 128 MiB, v7x 64 MiB physical).
    tb = _round_up(min(block_b, _round_up(B, 8)), 8)
    bp = _round_up(B, tb)
    if bp != B:
        pad = bp - B
        state = jnp.pad(state, ((0, pad), (0, 0)))
        action = jnp.pad(action, ((0, pad), (0, 0)))
        next_state = jnp.pad(next_state, ((0, pad), (0, 0)))

    grid = (bp // tb,)

    batch_spec = lambda d: pl.BlockSpec((tb, d), lambda i: (i, 0))
    const_spec = lambda shp: pl.BlockSpec(shp, lambda i: (0, 0))

    out = pl.pallas_call(
        functools.partial(_mlp_kernel, mxu_dtype=mxu_dtype),
        out_shape=jax.ShapeDtypeStruct((bp, 1), jnp.float32),
        grid=grid,
        in_specs=[
            batch_spec(sd),                                      # state
            batch_spec(ad),                                      # action
            batch_spec(sd),                                      # next_state
            const_spec((sd, H)),                                 # W1[:sd]
            const_spec((ad, H)),                                 # W1[sd:sd+ad]
            const_spec((sd, H)),                                 # W1[sd+ad:]
            const_spec((1, H)),                                  # b1
            const_spec((H, H)),                                  # W2
            const_spec((1, H)),                                  # b2
            const_spec((1, H)),                                  # W3 as a row
            pl.BlockSpec(memory_space=pltpu.MemorySpace.SMEM),   # b3 scalar
        ],
        out_specs=pl.BlockSpec((tb, 1), lambda i: (i, 0)),
        compiler_params=pltpu.CompilerParams(
            dimension_semantics=("parallel",),
            vmem_limit_bytes=32 * 1024 * 1024,
        ),
    )(state, action, next_state, w1s, w1a, w1ns, b1_2d, w2c, b2_2d,
      w3_row, b3_2d)

    return out[:B]


def init_params(key, state_dim, action_dim, hidden_dim=64):
    """Deterministic init matching the PyTorch module's parameter shapes
    (nn.Linear default: U(-1/sqrt(fan_in), 1/sqrt(fan_in)))."""
    din = state_dim + action_dim + state_dim
    keys = jax.random.split(key, 6)

    def lin(kw, kb, fan_in, fan_out):
        bound = 1.0 / jnp.sqrt(jnp.float32(fan_in))
        w = jax.random.uniform(kw, (fan_in, fan_out), jnp.float32, -bound, bound)
        b = jax.random.uniform(kb, (fan_out,), jnp.float32, -bound, bound)
        return w, b

    w1, b1 = lin(keys[0], keys[1], din, hidden_dim)
    w2, b2 = lin(keys[2], keys[3], hidden_dim, hidden_dim)
    w3, b3 = lin(keys[4], keys[5], hidden_dim, 1)
    return (w1, b1, w2, b2, w3, b3)


if __name__ == "__main__":
    # Hopper-ish dims: state_dim=11, action_dim=3, hidden=64.  batch=20
    # exercises both the 8-row padding path and (below) a multi-step grid.
    state_dim, action_dim, hidden_dim, batch = 11, 3, 64, 20

    key = jax.random.PRNGKey(0)
    k_s, k_a, k_ns, k_p = jax.random.split(key, 4)

    state = jax.random.normal(k_s, (batch, state_dim), jnp.float32)
    action = jax.random.normal(k_a, (batch, action_dim), jnp.float32)
    next_state = jax.random.normal(k_ns, (batch, state_dim), jnp.float32)

    params = init_params(k_p, state_dim, action_dim, hidden_dim)
    w1, b1, w2, b2, w3, b3 = params

    # Pure-JAX reference (matches the PyTorch module).
    x = jnp.concatenate([state, action, next_state], axis=-1)
    ref = jnp.tanh(x @ w1 + b1)
    ref = jnp.tanh(ref @ w2 + b2)
    ref = ref @ w3 + b3

    # 1) f32 end-to-end (tight structural check, single grid step).
    out_f32 = reward_predictor_forward(
        state, action, next_state, params, use_bf16_mxu=False)
    out_f32 = jax.block_until_ready(out_f32)
    assert out_f32.shape == (batch, 1)
    assert jnp.allclose(out_f32, ref, atol=5e-3, rtol=5e-3)

    # 2) bf16-MXU / f32-accumulate perf configuration, with a small batch
    #    tile so the 1-D batch grid takes several (pipelined) steps.
    out_bf16 = reward_predictor_forward(
        state, action, next_state, params, block_b=8, use_bf16_mxu=True)
    out_bf16 = jax.block_until_ready(out_bf16)
    assert out_bf16.shape == (batch, 1)
    assert jnp.allclose(out_bf16, ref, atol=5e-2, rtol=5e-2)

    print("KERNEL_OK")
</pallas_src>

<mosaic_0001>
module attributes {stable_mosaic.version = 11 : i64} {
  func.func @_mlp_kernel(%arg0: i32, %arg1: memref<24x11xf32, #tpu.memory_space<vmem>>, %arg2: memref<24x3xf32, #tpu.memory_space<vmem>>, %arg3: memref<24x11xf32, #tpu.memory_space<vmem>>, %arg4: memref<11x64xf32, #tpu.memory_space<vmem>>, %arg5: memref<3x64xf32, #tpu.memory_space<vmem>>, %arg6: memref<11x64xf32, #tpu.memory_space<vmem>>, %arg7: memref<1x64xf32, #tpu.memory_space<vmem>>, %arg8: memref<64x64xf32, #tpu.memory_space<vmem>>, %arg9: memref<1x64xf32, #tpu.memory_space<vmem>>, %arg10: memref<1x64xf32, #tpu.memory_space<vmem>>, %arg11: memref<1x1xf32, #tpu.memory_space<smem>>, %arg12: memref<24x1xf32, #tpu.memory_space<vmem>>) attributes {dimension_semantics = [#tpu.dimension_semantics<parallel>], iteration_bounds = array<i64: 1>, scalar_prefetch = 0 : i64, scratch_operands = 0 : i64, tpu.core_type = #tpu.core_type<tc>, window_params = [{transform_indices = @transform_0, window_bounds = array<i64: 24, 11>}, {transform_indices = @transform_1, window_bounds = array<i64: 24, 3>}, {transform_indices = @transform_2, window_bounds = array<i64: 24, 11>}, {pipeline_mode = #tpu.pipeline_mode<synchronous>, transform_indices = @transform_3, window_bounds = array<i64: 11, 64>}, {pipeline_mode = #tpu.pipeline_mode<synchronous>, transform_indices = @transform_4, window_bounds = array<i64: 3, 64>}, {pipeline_mode = #tpu.pipeline_mode<synchronous>, transform_indices = @transform_5, window_bounds = array<i64: 11, 64>}, {pipeline_mode = #tpu.pipeline_mode<synchronous>, transform_indices = @transform_6, window_bounds = array<i64: 1, 64>}, {pipeline_mode = #tpu.pipeline_mode<synchronous>, transform_indices = @transform_7, window_bounds = array<i64: 64, 64>}, {pipeline_mode = #tpu.pipeline_mode<synchronous>, transform_indices = @transform_8, window_bounds = array<i64: 1, 64>}, {pipeline_mode = #tpu.pipeline_mode<synchronous>, transform_indices = @transform_9, window_bounds = array<i64: 1, 64>}, {transform_indices = @transform_10, window_bounds = array<i64: 1, 1>}, {transform_indices = @transform_11, window_bounds = array<i64: 24, 1>}]} {
    %c0 = arith.constant 0 : index
    %c0_0 = arith.constant 0 : index
    %0 = vector.load %arg1[%c0, %c0_0] : memref<24x11xf32, #tpu.memory_space<vmem>>, vector<24x11xf32>
    %c0_1 = arith.constant 0 : index
    %c0_2 = arith.constant 0 : index
    %1 = vector.load %arg4[%c0_1, %c0_2] : memref<11x64xf32, #tpu.memory_space<vmem>>, vector<11x64xf32>
    %cst = arith.constant dense<0.000000e+00> : vector<24x64xf32>
    %2 = tpu.matmul %0, %1, %cst {dimension_numbers = #tpu.dot_dimension_numbers<[1], [0], [0], [1], [0, 0, 1, 1], [], []>} : vector<24x11xf32>, vector<11x64xf32>, vector<24x64xf32> -> vector<24x64xf32>
    %c0_3 = arith.constant 0 : index
    %c0_4 = arith.constant 0 : index
    %3 = vector.load %arg2[%c0_3, %c0_4] : memref<24x3xf32, #tpu.memory_space<vmem>>, vector<24x3xf32>
    %c0_5 = arith.constant 0 : index
    %c0_6 = arith.constant 0 : index
    %4 = vector.load %arg5[%c0_5, %c0_6] : memref<3x64xf32, #tpu.memory_space<vmem>>, vector<3x64xf32>
    %cst_7 = arith.constant dense<0.000000e+00> : vector<24x64xf32>
    %5 = tpu.matmul %3, %4, %cst_7 {dimension_numbers = #tpu.dot_dimension_numbers<[1], [0], [0], [1], [0, 0, 1, 1], [], []>} : vector<24x3xf32>, vector<3x64xf32>, vector<24x64xf32> -> vector<24x64xf32>
    %6 = arith.addf %2, %5 : vector<24x64xf32>
    %c0_8 = arith.constant 0 : index
    %c0_9 = arith.constant 0 : index
    %7 = vector.load %arg3[%c0_8, %c0_9] : memref<24x11xf32, #tpu.memory_space<vmem>>, vector<24x11xf32>
    %c0_10 = arith.constant 0 : index
    %c0_11 = arith.constant 0 : index
    %8 = vector.load %arg6[%c0_10, %c0_11] : memref<11x64xf32, #tpu.memory_space<vmem>>, vector<11x64xf32>
    %cst_12 = arith.constant dense<0.000000e+00> : vector<24x64xf32>
    %9 = tpu.matmul %7, %8, %cst_12 {dimension_numbers = #tpu.dot_dimension_numbers<[1], [0], [0], [1], [0, 0, 1, 1], [], []>} : vector<24x11xf32>, vector<11x64xf32>, vector<24x64xf32> -> vector<24x64xf32>
    %10 = arith.addf %6, %9 : vector<24x64xf32>
    %c0_13 = arith.constant 0 : index
    %c0_14 = arith.constant 0 : index
    %11 = vector.load %arg7[%c0_13, %c0_14] : memref<1x64xf32, #tpu.memory_space<vmem>>, vector<1x64xf32>
    %12 = vector.broadcast %11 : vector<1x64xf32> to vector<24x64xf32>
    %13 = arith.addf %10, %12 : vector<24x64xf32>
    %14 = math.tanh %13 : vector<24x64xf32>
    %c0_15 = arith.constant 0 : index
    %c0_16 = arith.constant 0 : index
    %15 = vector.load %arg8[%c0_15, %c0_16] : memref<64x64xf32, #tpu.memory_space<vmem>>, vector<64x64xf32>
    %cst_17 = arith.constant dense<0.000000e+00> : vector<24x64xf32>
    %16 = tpu.matmul %14, %15, %cst_17 {dimension_numbers = #tpu.dot_dimension_numbers<[1], [0], [0], [1], [0, 0, 1, 1], [], []>} : vector<24x64xf32>, vector<64x64xf32>, vector<24x64xf32> -> vector<24x64xf32>
    %c0_18 = arith.constant 0 : index
    %c0_19 = arith.constant 0 : index
    %17 = vector.load %arg9[%c0_18, %c0_19] : memref<1x64xf32, #tpu.memory_space<vmem>>, vector<1x64xf32>
    %18 = vector.broadcast %17 : vector<1x64xf32> to vector<24x64xf32>
    %19 = arith.addf %16, %18 : vector<24x64xf32>
    %20 = math.tanh %19 : vector<24x64xf32>
    %c0_20 = arith.constant 0 : index
    %c0_21 = arith.constant 0 : index
    %21 = vector.load %arg10[%c0_20, %c0_21] : memref<1x64xf32, #tpu.memory_space<vmem>>, vector<1x64xf32>
    %22 = vector.broadcast %21 : vector<1x64xf32> to vector<24x64xf32>
    %23 = arith.mulf %20, %22 : vector<24x64xf32>
    %cst_22 = arith.constant dense<0.000000e+00> : vector<24xf32>
    %24 = vector.multi_reduction <add>, %23, %cst_22 [1] : vector<24x64xf32> to vector<24xf32>
    %25 = vector.shape_cast %24 : vector<24xf32> to vector<24x1xf32>
    %c0_23 = arith.constant 0 : index
    %c0_24 = arith.constant 0 : index
    %26 = memref.load %arg11[%c0_23, %c0_24] : memref<1x1xf32, #tpu.memory_space<smem>>
    %27 = vector.broadcast %26 : f32 to vector<24x1xf32>
    %28 = arith.addf %25, %27 : vector<24x1xf32>
    %c0_25 = arith.constant 0 : index
    %c0_26 = arith.constant 0 : index
    %29 = vector.load %arg12[%c0_25, %c0_26] : memref<24x1xf32, #tpu.memory_space<vmem>>, vector<24x1xf32>
    tpu.vector_store %arg12[%c0_25, %c0_26], %28 {strides = array<i32>} : memref<24x1xf32, #tpu.memory_space<vmem>>, vector<24x1xf32>,
    return
  }
  func.func @transform_0(%arg0: i32) -> (i32, i32) {
    %c0_i32 = arith.constant 0 : i32
    %c0_i32_0 = arith.constant 0 : i32
    return %arg0, %c0_i32 : i32, i32
  }
  func.func @transform_1(%arg0: i32) -> (i32, i32) {
    %c0_i32 = arith.constant 0 : i32
    %c0_i32_0 = arith.constant 0 : i32
    return %arg0, %c0_i32 : i32, i32
  }
  func.func @transform_2(%arg0: i32) -> (i32, i32) {
    %c0_i32 = arith.constant 0 : i32
    %c0_i32_0 = arith.constant 0 : i32
    return %arg0, %c0_i32 : i32, i32
  }
  func.func @transform_3(%arg0: i32) -> (i32, i32) {
    %c0_i32 = arith.constant 0 : i32
    %c0_i32_0 = arith.constant 0 : i32
    %c0_i32_1 = arith.constant 0 : i32
    return %c0_i32, %c0_i32_0 : i32, i32
  }
  func.func @transform_4(%arg0: i32) -> (i32, i32) {
    %c0_i32 = arith.constant 0 : i32
    %c0_i32_0 = arith.constant 0 : i32
    %c0_i32_1 = arith.constant 0 : i32
    return %c0_i32, %c0_i32_0 : i32, i32
  }
  func.func @transform_5(%arg0: i32) -> (i32, i32) {
    %c0_i32 = arith.constant 0 : i32
    %c0_i32_0 = arith.constant 0 : i32
    %c0_i32_1 = arith.constant 0 : i32
    return %c0_i32, %c0_i32_0 : i32, i32
  }
  func.func @transform_6(%arg0: i32) -> (i32, i32) {
    %c0_i32 = arith.constant 0 : i32
    %c0_i32_0 = arith.constant 0 : i32
    %c0_i32_1 = arith.constant 0 : i32
    return %c0_i32, %c0_i32_0 : i32, i32
  }
  func.func @transform_7(%arg0: i32) -> (i32, i32) {
    %c0_i32 = arith.constant 0 : i32
    %c0_i32_0 = arith.constant 0 : i32
    %c0_i32_1 = arith.constant 0 : i32
    return %c0_i32, %c0_i32_0 : i32, i32
  }
  func.func @transform_8(%arg0: i32) -> (i32, i32) {
    %c0_i32 = arith.constant 0 : i32
    %c0_i32_0 = arith.constant 0 : i32
    %c0_i32_1 = arith.constant 0 : i32
    return %c0_i32, %c0_i32_0 : i32, i32
  }
  func.func @transform_9(%arg0: i32) -> (i32, i32) {
    %c0_i32 = arith.constant 0 : i32
    %c0_i32_0 = arith.constant 0 : i32
    %c0_i32_1 = arith.constant 0 : i32
    return %c0_i32, %c0_i32_0 : i32, i32
  }
  func.func @transform_10(%arg0: i32) -> (i32, i32) {
    %c0_i32 = arith.constant 0 : i32
    %c0_i32_0 = arith.constant 0 : i32
    %c0_i32_1 = arith.constant 0 : i32
    return %c0_i32, %c0_i32_0 : i32, i32
  }
  func.func @transform_11(%arg0: i32) -> (i32, i32) {
    %c0_i32 = arith.constant 0 : i32
    %c0_i32_0 = arith.constant 0 : i32
    return %arg0, %c0_i32 : i32, i32
  }
}

</mosaic_0001>

<bundles_post_ra>
// kernel: tpu_custom_call.1
= control target key start
LH: loop header
LB: loop body
LE: loop exit
PB: predicated region body
PF: predicated region fallthrough
CT: control target
= control target key end

     0   :  { %17 = vsyncpa [#allocation4], 0  ;;  %s347_s20 = smov [#allocation3]   ;;  %s348_s22 = smov 128   ;;  %s491_s0 = inlined_call_operand.vmem [shape: f32[24,11], index: 0, kind: input, shape index: {}]   ;;  %s492_s1 = inlined_call_operand.vmem [shape: f32[24,3], index: 1, kind: input, shape index: {}]   ;;  %s493_s2 = inlined_call_operand.vmem [shape: f32[24,11], index: 2, kind: input, shape index: {}]   ;;  %s494_s3 = inlined_call_operand.vmem [shape: f32[11,64], index: 3, kind: input, shape index: {}]   ;;  %s495_s4 = inlined_call_operand.vmem [shape: f32[3,64], index: 4, kind: input, shape index: {}]   ;;  %s496_s5 = inlined_call_operand.vmem [shape: f32[11,64], index: 5, kind: input, shape index: {}]   ;;  %s497_s6 = inlined_call_operand.vmem [shape: f32[1,64], index: 6, kind: input, shape index: {}]   ;;  %s498_s7 = inlined_call_operand.hbm [shape: f32[64,64], index: 7, kind: input, shape index: {}]   ;;  %s499_s8 = inlined_call_operand.vmem [shape: f32[1,64], index: 8, kind: input, shape index: {}]   ;;  %s500_s9 = inlined_call_operand.vmem [shape: f32[1,64], index: 9, kind: input, shape index: {}]   ;;  %s501_s10 = inlined_call_operand.<no memory space> [shape: f32[1,1], index: 10, kind: input, shape index: {}]   ;;  %s502_s11 = inlined_call_operand.vmem [shape: f32[24,1], index: 11, kind: output, shape index: {}]  }
   0x1   :  { %s36_s19 = sshll.u32 %s498_s7, 4  ;;  %s38_s21 = sshll.u32 %s347_s20, 4  ;;  %s37_s19 = int_to_ptr.hbm [resolvable:$true] %s36_s19  ;;  %s39_s21 = int_to_ptr.vmem [resolvable:$true] %s38_s21 }
   0x2   :  { %s349_s23 = smov 8  }
   0x3   :  { %44 = dma.hbm_to_vmem [thread:$0]  %s37_s19, 1024, %s39_s21, [#allocation4], %s348_s22, %s348_s22, %s349_s23  }
   0x4   :  { %345 = dma.done.wait [#allocation4], 1024  }
   0x5   :  { %346 = vsyncadd [#allocation4], 4294966272  ;;  %vm74_vm0 = vcmask 1042432   ;;  %v147_v0 = vld [vmem:[%s496_s5 + $0x8] sm:$0x7]  ;;  %v146_v1 = vld [vmem:[%s496_s5] sm:$0xff]  ;;  %v267_v61 = vstv %s501_s10 }
   0x6   :  { %v143_v2 = vld [vmem:[%s493_s2] sm:$0xff]  ;;  %vm64_vm1 = vcmask 23552   ;;  %288 = vmatpush.msk.msra.mxu2 %vm74_vm0, %v147_v0  ;;  %vm104_vm2 = vcmask 89088   ;;  %v59_v3 = vld [vmem:[%s494_s3 + $0x8] sm:$0x7]  ;;  %v206_v8 = vld [vmem:[#allocation3 + $0x38] sm:$0xff] }
   0x7   :  { %v63_v4 = vld [vmem:[%s495_s4] sm:$0x7]  ;;  %284 = vmatpush.msk.msra.mxu1 %vm74_vm0, %v59_v3  ;;  %295 = vmatpush.msra.mxu3 %v206_v8  ;;  %v61_v9 = vld [vmem:[%s492_s1 + $0x8] sm:$0xff]  ;;  %v62_v12 = vld [vmem:[%s492_s1 + $0x10] sm:$0xff]  ;;  %vm211_vm3 = vcmask 523264   ;;  %vm271_vm4 = vcmask 7168  }
   0x8   :  { %v58_v5 = vld [vmem:[%s494_s3] sm:$0xff]  ;;  %280 = vmatpush.msk.msra.mxu0 %vm74_vm0, %v63_v4  ;;  %175 = vmatpush.msra.mxu2 %v146_v1  ;;  %v144_v10 = vld [vmem:[%s493_s2 + $0x8] sm:$0xff]  ;;  %v145_v13 = vld [vmem:[%s493_s2 + $0x10] sm:$0xff] }
   0x9   :  { %v60_v6 = vld [vmem:[%s492_s1] sm:$0xff]  ;;  %289 = vmatmul.msk.f32.vlgmr.msra.gmra.mxu2 %vm104_vm2, %v143_v2  ;;  %132 = vmatpush.msra.mxu1 %v58_v5  ;;  %v56_v11 = vld [vmem:[%s491_s0 + $0x8] sm:$0xff]  ;;  %v57_v14 = vld [vmem:[%s491_s0 + $0x10] sm:$0xff] }
   0xa   :  { %v55_v7 = vld [vmem:[%s491_s0] sm:$0xff]  ;;  %281 = vmatmul.msk.f32.vlgmr.msra.gmra.mxu0 %vm64_vm1, %v60_v6  ;;  %v205_v15 = vld [vmem:[#allocation3 + $0x30] sm:$0xff]  ;;  %v204_v16 = vld [vmem:[#allocation3 + $0x28] sm:$0xff] }
   0xb   :  { %285 = vmatmul.msk.f32.vlgmr.msra.gmra.mxu1 %vm104_vm2, %v55_v7  ;;  %229 = vmatpush.msrb.mxu0 %v206_v8  ;;  %v203_v17 = vld [vmem:[#allocation3 + $0x20] sm:$0xff]  ;;  %v202_v18 = vld [vmem:[#allocation3 + $0x18] sm:$0xff]  ;;  %v201_v19 = vld [vmem:[#allocation3 + $0x10] sm:$0xff] }
   0xc   :  { %296 = vmatpush.msra.mxu3 %v205_v15  ;;  %v200_v20 = vld [vmem:[#allocation3 + $0x8] sm:$0xff]  ;;  %v199_v21 = vld [vmem:[#allocation3] sm:$0xff] }
   0xd   :  { %230 = vmatpush.msrb.mxu0 %v205_v15  ;;  %v306_v25 = vld [vmem:[%s497_s6] ss:$0 sm:$0xff] }
   0xe   :  { %297 = vmatpush.msra.mxu3 %v204_v16  ;;  %v307_v44 = vld [vmem:[%s499_s8] ss:$0 sm:$0xff] }
   0xf   :  { %231 = vmatpush.msrb.mxu0 %v204_v16  ;;  %v308_v47 = vld [vmem:[%s500_s9] ss:$0 sm:$0xff] }
  0x10   :  { %298 = vmatpush.msra.mxu3 %v203_v17 }
  0x11   :  { %290 = vmatmul.msk.f32.gmra.mxu2 %vm104_vm2, %v144_v10  ;;  %232 = vmatpush.msrb.mxu0 %v203_v17 }
  0x12   :  { %282 = vmatmul.msk.f32.gmra.mxu0 %vm64_vm1, %v61_v9  ;;  %299 = vmatpush.msra.mxu3 %v202_v18 }
  0x13   :  { %286 = vmatmul.msk.f32.gmra.mxu1 %vm104_vm2, %v56_v11  ;;  %233 = vmatpush.msrb.mxu0 %v202_v18 }
  0x14   :  { %300 = vmatpush.msra.mxu3 %v201_v19 }
  0x15   :  { %234 = vmatpush.msrb.mxu0 %v201_v19 }
  0x16   :  { %301 = vmatpush.msra.mxu3 %v200_v20 }
  0x17   :  { %235 = vmatpush.msrb.mxu0 %v200_v20 }
  0x18   :  { %302 = vmatpush.msra.mxu3 %v199_v21 }
  0x19   :  { %291 = vmatmul.msk.f32.gmra.mxu2 %vm104_vm2, %v145_v13  ;;  %236 = vmatpush.msrb.mxu0 %v199_v21 }
  0x1a   :  { %283 = vmatmul.msk.f32.gmra.mxu0 %vm64_vm1, %v62_v12 }
  0x1b   :  { %287 = vmatmul.msk.f32.gmra.mxu1 %vm104_vm2, %v57_v14 }
  0x87   :  { %v95_v22 = vpop.f32.mrf.mxu0 }
  0x88   :  { %v134_v23 = vpop.f32.mrf.mxu1 }
  0x89   :  { %v135_v24 = vadd.f32 %v134_v23, %v95_v22 }
  0x8c   :  { %v177_v26 = vpop.f32.mrf.mxu2 }
  0x8d   :  { %v186_v27 = vadd.f32 %v177_v26, %v135_v24 }
  0x8f   :  { %v98_v28 = vpop.f32.mrf.mxu0  ;;  %v193_v29 = vadd.f32 %v306_v25, %v186_v27 }
  0x90   :  { %v137_v30 = vpop.f32.mrf.mxu1 }
  0x91   :  { %309 = vtanh.f32 %v193_v29  ;;  %v138_v31 = vadd.f32 %v137_v30, %v98_v28 }
  0x94   :  { %v180_v32 = vpop.f32.mrf.mxu2 }
  0x95   :  { %v187_v33 = vadd.f32 %v180_v32, %v138_v31 }
  0x97   :  { %v101_v34 = vpop.f32.mrf.mxu0  ;;  %v310_v35 = vpop.eup %309  ;;  %v194_v36 = vadd.f32 %v306_v25, %v187_v33 }
  0x98   :  { %v140_v37 = vpop.f32.mrf.mxu1  ;;  %292 = vmatmul.msk.f32.vlgmr.msrb.gmra.mxu0 %vm211_vm3, %v310_v35 }
  0x99   :  { %311 = vtanh.f32 %v194_v36  ;;  %v141_v38 = vadd.f32 %v140_v37, %v101_v34 }
  0x9c   :  { %v183_v39 = vpop.f32.mrf.mxu2 }
  0x9d   :  { %v188_v40 = vadd.f32 %v183_v39, %v141_v38 }
  0x9f   :  { %v312_v41 = vpop.eup %311  ;;  %v195_v42 = vadd.f32 %v306_v25, %v188_v40 }
  0xa0   :  { %293 = vmatmul.msk.f32.vlgmr.msra.gmra.mxu3 %vm211_vm3, %v312_v41 }
  0xa1   :  { %313 = vtanh.f32 %v195_v42 }
  0xa7   :  { %v314_v43 = vpop.eup %313 }
  0xa8   :  { %294 = vmatmul.msk.f32.gmra.mxu3 %vm211_vm3, %v314_v43 }
 0x115   :  { %v238_v45 = vpop.f32.mrf.mxu0 }
 0x116   :  { %v239_v46 = vadd.f32 %v307_v44, %v238_v45 }
 0x118   :  { %315 = vtanh.f32 %v239_v46 }
 0x11e   :  { %v316_v48 = vpop.eup %315 }
 0x11f   :  { %v254_v49 = vmul.f32 %v316_v48, %v308_v47 }
 0x121   :  { %v257_v50 = vsel %vm211_vm3, %v254_v49, 0.0 }
 0x122   :  { %258 = vadd.xlane.f32.xlu0 %v257_v50 }
 0x123   :  { %v241_v51 = vpop.f32.mrf.mxu3 }
 0x124   :  { %v242_v52 = vadd.f32 %v307_v44, %v241_v51 }
 0x126   :  { %317 = vtanh.f32 %v242_v52 }
 0x12b   :  { %v244_v53 = vpop.f32.mrf.mxu3 }
 0x12c   :  { %v318_v54 = vpop.eup %317  ;;  %v245_v55 = vadd.f32 %v307_v44, %v244_v53 }
 0x12d   :  { %v255_v56 = vmul.f32 %v318_v54, %v308_v47 }
 0x12e   :  { %319 = vtanh.f32 %v245_v55 }
 0x12f   :  { %v260_v57 = vsel %vm211_vm3, %v255_v56, 0.0 }
 0x130   :  { %261 = vadd.xlane.f32.xlu0 %v260_v57 }
 0x134   :  { %v320_v58 = vpop.eup %319 }
 0x135   :  { %v256_v59 = vmul.f32 %v320_v58, %v308_v47 }
 0x137   :  { %v263_v60 = vsel %vm211_vm3, %v256_v59, 0.0 }
 0x138   :  { %264 = vadd.xlane.f32.xlu1 %v263_v60 }
 0x195   :  { %v259_v62 = vpop.xlane.xlu0 %258 }
 0x196   :  { %v268_v63 = vadd.f32 %v267_v61, %v259_v62 }
 0x198   :  { %272 = vst.msk [vmem:[%s502_s11] sm:$0xff] %vm271_vm4, %v268_v63 }
 0x1a3   :  { %v262_v0 = vpop.xlane.xlu0 %261 }
 0x1a4   :  { %v269_v1 = vadd.f32 %v267_v61, %v262_v0 }
 0x1a6   :  { %273 = vst.msk [vmem:[%s502_s11 + $0x8] sm:$0xff] %vm271_vm4, %v269_v1 }
 0x1ab   :  { %v265_v2 = vpop.xlane.xlu1 %264 }
 0x1ac   :  { %v270_v3 = vadd.f32 %v267_v61, %v265_v2 }
 0x1ae   :  { %274 = vst.msk [vmem:[%s502_s11 + $0x10] sm:$0xff] %vm271_vm4, %v270_v3 }
 0x1af   :  { %279 = vsyncpa [#allocation4], 1 }

</bundles_post_ra>
